<compile_context>
chip_gen: v7x
topology: tpu7x:2x2x1
jax: 0.10.0
libtpu: 0.0.40
codegen_flags: <defaults>
</compile_context>

<pallas_src>
import functools

import jax
import jax.numpy as jnp
from jax.experimental import pallas as pl
from jax.experimental.pallas import tpu as pltpu

HIDDEN = 256
OUT_RAW = 784          # 28 * 28
OUT_PAD = 896          # 7 * 128 -> lane-dense output tile


def _round_up(n: int, m: int) -> int:
    return ((n + m - 1) // m) * m


def generator_kernel(x_ref, w1_ref, b1_ref, w2_ref, b2_ref, o_ref, h_ref):
    # layer1: x @ W1 + b1, ReLU  (f32 accumulation on the MXU)
    h = jnp.dot(x_ref[...], w1_ref[...], preferred_element_type=jnp.float32)
    h = jnp.maximum(h + b1_ref[...], 0.0)
    # stage hidden activation in VMEM scratch (bounded vreg pressure at large TILE_B)
    h_ref[...] = h
    # layer2: h @ W2 + b2, ReLU (W2/b2 are zero-padded to 896 lanes)
    y = jnp.dot(h_ref[...], w2_ref[...], preferred_element_type=jnp.float32)
    y = jnp.maximum(y + b2_ref[...], 0.0)
    o_ref[...] = y.astype(o_ref.dtype)


@functools.partial(jax.jit, static_argnames=("tile_b",))
def generator_forward(x, w1, b1, w2, b2, *, tile_b: int = 2048):
    """x: (B, latent_z_dim) f32 -> (B, 1, 28, 28) f32 (NCHW), matching PyTorch."""
    B, latent = x.shape
    b1 = b1.reshape(1, HIDDEN)
    b2 = b2.reshape(1, OUT_RAW)

    # Zero-pad layer-2 weights/bias to a lane-dense width (ReLU(0)=0, sliced off below).
    w2p = jnp.zeros((HIDDEN, OUT_PAD), w2.dtype).at[:, :OUT_RAW].set(w2)
    b2p = jnp.zeros((1, OUT_PAD), b2.dtype).at[:, :OUT_RAW].set(b2)

    # Batch tile: multiple of 8 (sublane), capped at tile_b; pad batch to a tile multiple.
    TILE_B = min(tile_b, _round_up(B, 8))
    B_pad = _round_up(B, TILE_B)
    if B_pad != B:
        x = jnp.pad(x, ((0, B_pad - B), (0, 0)))

    grid = (B_pad // TILE_B,)

    flops = 2 * B_pad * (latent * HIDDEN + HIDDEN * OUT_PAD)
    bytes_accessed = 4 * (
        B_pad * latent                      # x
        + latent * HIDDEN + HIDDEN          # w1, b1
        + HIDDEN * OUT_PAD + OUT_PAD        # w2, b2
        + B_pad * OUT_PAD                   # output
    )

    out_flat = pl.pallas_call(
        generator_kernel,
        out_shape=jax.ShapeDtypeStruct((B_pad, OUT_PAD), jnp.float32),
        grid_spec=pltpu.PrefetchScalarGridSpec(
            num_scalar_prefetch=0,
            grid=grid,
            in_specs=[
                pl.BlockSpec((TILE_B, latent), lambda i: (i, 0)),   # x: pipelined over batch
                pl.BlockSpec((latent, HIDDEN), lambda i: (0, 0)),   # w1: VMEM-resident
                pl.BlockSpec((1, HIDDEN), lambda i: (0, 0)),        # b1: VMEM-resident
                pl.BlockSpec((HIDDEN, OUT_PAD), lambda i: (0, 0)),  # w2: VMEM-resident
                pl.BlockSpec((1, OUT_PAD), lambda i: (0, 0)),       # b2: VMEM-resident
            ],
            out_specs=pl.BlockSpec((TILE_B, OUT_PAD), lambda i: (i, 0)),
            scratch_shapes=[pltpu.VMEM((TILE_B, HIDDEN), jnp.float32)],
        ),
        compiler_params=pltpu.CompilerParams(
            dimension_semantics=("parallel",),   # shards batch tiles across TCs on v7x
        ),
        cost_estimate=pl.CostEstimate(
            flops=flops, transcendentals=0, bytes_accessed=bytes_accessed),
    )(x, w1, b1, w2p, b2p)

    # Drop padding (batch rows + lane columns), then PyTorch `view(-1, 1, 28, 28)`.
    return out_flat[:B, :OUT_RAW].reshape(-1, 1, 28, 28)


def init_params(key, latent_z_dim):
    """Deterministic init mimicking nn.Linear (uniform +-1/sqrt(fan_in)).

    Weights are stored transposed relative to PyTorch -> (in_features, out_features),
    so the kernel computes x @ W directly.
    """
    k1, k2, k3, k4 = jax.random.split(key, 4)
    bound1 = 1.0 / jnp.sqrt(float(latent_z_dim))
    bound2 = 1.0 / jnp.sqrt(float(HIDDEN))
    w1 = jax.random.uniform(k1, (latent_z_dim, HIDDEN), jnp.float32, -bound1, bound1)
    b1 = jax.random.uniform(k2, (1, HIDDEN), jnp.float32, -bound1, bound1)
    w2 = jax.random.uniform(k3, (HIDDEN, OUT_RAW), jnp.float32, -bound2, bound2)
    b2 = jax.random.uniform(k4, (1, OUT_RAW), jnp.float32, -bound2, bound2)
    return w1, b1, w2, b2


if __name__ == "__main__":
    latent_z_dim = 32
    batch = 8

    key = jax.random.PRNGKey(0)
    kx, kp = jax.random.split(key)
    x = jax.random.normal(kx, (batch, latent_z_dim), dtype=jnp.float32)
    w1, b1, w2, b2 = init_params(kp, latent_z_dim)

    out = generator_forward(x, w1, b1, w2, b2)
    out = jax.block_until_ready(out)

    # Sanity check vs. plain JAX reference (pure f32 path -> tight tolerance).
    h_ref = jnp.maximum(x @ w1 + b1, 0.0)
    y_ref = jnp.maximum(h_ref @ w2 + b2, 0.0).reshape(-1, 1, 28, 28)
    assert out.shape == (batch, 1, 28, 28)
    assert jnp.allclose(out, y_ref, atol=1e-5, rtol=1e-5)

    print("KERNEL_OK")
</pallas_src>

<mosaic_0001>
module attributes {stable_mosaic.version = 11 : i64} {
  func.func @generator_kernel(%arg0: i32, %arg1: memref<8x32xf32, #tpu.memory_space<vmem>>, %arg2: memref<32x256xf32, #tpu.memory_space<vmem>>, %arg3: memref<1x256xf32, #tpu.memory_space<vmem>>, %arg4: memref<256x896xf32, #tpu.memory_space<vmem>>, %arg5: memref<1x896xf32, #tpu.memory_space<vmem>>, %arg6: memref<8x896xf32, #tpu.memory_space<vmem>>, %arg7: memref<8x256xf32, #tpu.memory_space<vmem>>) attributes {dimension_semantics = [#tpu.dimension_semantics<parallel>], iteration_bounds = array<i64: 1>, scalar_prefetch = 0 : i64, scratch_operands = 1 : i64, tpu.core_type = #tpu.core_type<tc>, window_params = [{transform_indices = @transform_0, window_bounds = array<i64: 8, 32>}, {pipeline_mode = #tpu.pipeline_mode<synchronous>, transform_indices = @transform_1, window_bounds = array<i64: 32, 256>}, {pipeline_mode = #tpu.pipeline_mode<synchronous>, transform_indices = @transform_2, window_bounds = array<i64: 1, 256>}, {pipeline_mode = #tpu.pipeline_mode<synchronous>, transform_indices = @transform_3, window_bounds = array<i64: 256, 896>}, {pipeline_mode = #tpu.pipeline_mode<synchronous>, transform_indices = @transform_4, window_bounds = array<i64: 1, 896>}, {transform_indices = @transform_5, window_bounds = array<i64: 8, 896>}]} {
    %c0 = arith.constant 0 : index
    %c0_0 = arith.constant 0 : index
    %0 = vector.load %arg1[%c0, %c0_0] : memref<8x32xf32, #tpu.memory_space<vmem>>, vector<8x32xf32>
    %c0_1 = arith.constant 0 : index
    %c0_2 = arith.constant 0 : index
    %1 = vector.load %arg2[%c0_1, %c0_2] : memref<32x256xf32, #tpu.memory_space<vmem>>, vector<32x256xf32>
    %cst = arith.constant dense<0.000000e+00> : vector<8x256xf32>
    %2 = tpu.matmul %0, %1, %cst {dimension_numbers = #tpu.dot_dimension_numbers<[1], [0], [0], [1], [0, 0, 1, 1], [], []>} : vector<8x32xf32>, vector<32x256xf32>, vector<8x256xf32> -> vector<8x256xf32>
    %c0_3 = arith.constant 0 : index
    %c0_4 = arith.constant 0 : index
    %3 = vector.load %arg3[%c0_3, %c0_4] : memref<1x256xf32, #tpu.memory_space<vmem>>, vector<1x256xf32>
    %4 = vector.broadcast %3 : vector<1x256xf32> to vector<8x256xf32>
    %5 = arith.addf %2, %4 : vector<8x256xf32>
    %cst_5 = arith.constant 0.000000e+00 : f32
    %6 = vector.broadcast %cst_5 : f32 to vector<8x256xf32>
    %7 = arith.maximumf %5, %6 : vector<8x256xf32>
    %c0_6 = arith.constant 0 : index
    %c0_7 = arith.constant 0 : index
    %8 = vector.load %arg7[%c0_6, %c0_7] : memref<8x256xf32, #tpu.memory_space<vmem>>, vector<8x256xf32>
    tpu.vector_store %arg7[%c0_6, %c0_7], %7 {strides = array<i32>} : memref<8x256xf32, #tpu.memory_space<vmem>>, vector<8x256xf32>,
    %c0_8 = arith.constant 0 : index
    %c0_9 = arith.constant 0 : index
    %9 = vector.load %arg7[%c0_8, %c0_9] : memref<8x256xf32, #tpu.memory_space<vmem>>, vector<8x256xf32>
    %c0_10 = arith.constant 0 : index
    %c0_11 = arith.constant 0 : index
    %10 = vector.load %arg4[%c0_10, %c0_11] : memref<256x896xf32, #tpu.memory_space<vmem>>, vector<256x896xf32>
    %cst_12 = arith.constant dense<0.000000e+00> : vector<8x896xf32>
    %11 = tpu.matmul %9, %10, %cst_12 {dimension_numbers = #tpu.dot_dimension_numbers<[1], [0], [0], [1], [0, 0, 1, 1], [], []>} : vector<8x256xf32>, vector<256x896xf32>, vector<8x896xf32> -> vector<8x896xf32>
    %c0_13 = arith.constant 0 : index
    %c0_14 = arith.constant 0 : index
    %12 = vector.load %arg5[%c0_13, %c0_14] : memref<1x896xf32, #tpu.memory_space<vmem>>, vector<1x896xf32>
    %13 = vector.broadcast %12 : vector<1x896xf32> to vector<8x896xf32>
    %14 = arith.addf %11, %13 : vector<8x896xf32>
    %cst_15 = arith.constant 0.000000e+00 : f32
    %15 = vector.broadcast %cst_15 : f32 to vector<8x896xf32>
    %16 = arith.maximumf %14, %15 : vector<8x896xf32>
    %c0_16 = arith.constant 0 : index
    %c0_17 = arith.constant 0 : index
    %17 = vector.load %arg6[%c0_16, %c0_17] : memref<8x896xf32, #tpu.memory_space<vmem>>, vector<8x896xf32>
    tpu.vector_store %arg6[%c0_16, %c0_17], %16 {strides = array<i32>} : memref<8x896xf32, #tpu.memory_space<vmem>>, vector<8x896xf32>,
    return
  }
  func.func @transform_0(%arg0: i32) -> (i32, i32) {
    %c0_i32 = arith.constant 0 : i32
    %c0_i32_0 = arith.constant 0 : i32
    return %arg0, %c0_i32 : i32, i32
  }
  func.func @transform_1(%arg0: i32) -> (i32, i32) {
    %c0_i32 = arith.constant 0 : i32
    %c0_i32_0 = arith.constant 0 : i32
    %c0_i32_1 = arith.constant 0 : i32
    return %c0_i32, %c0_i32_0 : i32, i32
  }
  func.func @transform_2(%arg0: i32) -> (i32, i32) {
    %c0_i32 = arith.constant 0 : i32
    %c0_i32_0 = arith.constant 0 : i32
    %c0_i32_1 = arith.constant 0 : i32
    return %c0_i32, %c0_i32_0 : i32, i32
  }
  func.func @transform_3(%arg0: i32) -> (i32, i32) {
    %c0_i32 = arith.constant 0 : i32
    %c0_i32_0 = arith.constant 0 : i32
    %c0_i32_1 = arith.constant 0 : i32
    return %c0_i32, %c0_i32_0 : i32, i32
  }
  func.func @transform_4(%arg0: i32) -> (i32, i32) {
    %c0_i32 = arith.constant 0 : i32
    %c0_i32_0 = arith.constant 0 : i32
    %c0_i32_1 = arith.constant 0 : i32
    return %c0_i32, %c0_i32_0 : i32, i32
  }
  func.func @transform_5(%arg0: i32) -> (i32, i32) {
    %c0_i32 = arith.constant 0 : i32
    %c0_i32_0 = arith.constant 0 : i32
    return %arg0, %c0_i32 : i32, i32
  }
}

</mosaic_0001>

<bundles_post_ra>
// kernel: generator_forward.1
= control target key start
LH: loop header
LB: loop body
LE: loop exit
PB: predicated region body
PF: predicated region fallthrough
CT: control target
= control target key end

     0   :  { %v953_v3 = vmov 0.0   ;;  %vm41_vm0 = vcmask 261120   ;;  %s1733_s1 = inlined_call_operand.vmem [shape: f32[32,256], index: 1, kind: input, shape index: {}]   ;;  %s1734_s3 = inlined_call_operand.vmem [shape: f32[256,896], index: 3, kind: input, shape index: {}]   ;;  %s1735_s0 = inlined_call_operand.vmem [shape: f32[8,32], index: 0, kind: input, shape index: {}]   ;;  %s1736_s2 = inlined_call_operand.vmem [shape: f32[1,256], index: 2, kind: input, shape index: {}]   ;;  %s1737_s4 = inlined_call_operand.vmem [shape: f32[1,896], index: 4, kind: input, shape index: {}]   ;;  %s1738_s5 = inlined_call_operand.vmem [shape: f32[8,896], index: 5, kind: output, shape index: {}]  }
   0x1   :  { %v22_v0 = vld [vmem:[%s1733_s1 + $0x8] sm:$0xff]  ;;  %v24_v1 = vld [vmem:[%s1733_s1 + $0x18] sm:$0xff]  ;;  %v21_v2 = vld [vmem:[%s1733_s1] sm:$0xff]  ;;  %109 = vmatprep.mubr.f32.mxu0 %v953_v3 }
   0x2   :  { %v720_v4 = vpack.c.bf16 %v24_v1, %v22_v0  ;;  %v23_v5 = vld [vmem:[%s1733_s1 + $0x10] sm:$0xff]  ;;  %v26_v6 = vld [vmem:[%s1733_s1 + $0x28] sm:$0xff]  ;;  %v28_v7 = vld [vmem:[%s1733_s1 + $0x38] sm:$0xff] }
   0x3   :  { %v722_v8 = vpack.c.bf16 %v23_v5, %v21_v2  ;;  %v724_v9 = vpack.c.bf16 %v28_v7, %v26_v6  ;;  %v25_v10 = vld [vmem:[%s1733_s1 + $0x20] sm:$0xff]  ;;  %v27_v11 = vld [vmem:[%s1733_s1 + $0x30] sm:$0xff]  ;;  %v123_v12 = vld [vmem:[%s1734_s3 + $0x8] sm:$0xff] }
   0x4   :  { %721 = vmatprep.subr.bf16.mxu0 %v720_v4  ;;  %v130_v13 = vld [vmem:[%s1734_s3 + $0x40] sm:$0xff]  ;;  %v125_v14 = vld [vmem:[%s1734_s3 + $0x18] sm:$0xff]  ;;  %v726_v15 = vpack.c.bf16 %v27_v11, %v25_v10  ;;  %v132_v17 = vld [vmem:[%s1734_s3 + $0x50] sm:$0xff] }
   0x5   :  { %723 = vmatpush1.bf16.msra.mxu0 %v722_v8  ;;  %v728_v16 = vpack.c.bf16 %v130_v13, %v123_v12  ;;  %v122_v18 = vld [vmem:[%s1734_s3] sm:$0xff]  ;;  %v129_v19 = vld [vmem:[%s1734_s3 + $0x38] sm:$0xff]  ;;  %v792_v20 = vpack.c.bf16 %v132_v17, %v125_v14  ;;  %v124_v22 = vld [vmem:[%s1734_s3 + $0x10] sm:$0xff] }
   0x6   :  { %725 = vmatprep.subr.bf16.mxu0 %v724_v9  ;;  %v730_v21 = vpack.c.bf16 %v129_v19, %v122_v18  ;;  %v131_v23 = vld [vmem:[%s1734_s3 + $0x48] sm:$0xff]  ;;  %v137_v24 = vld [vmem:[%s1734_s3 + $0x78] sm:$0xff]  ;;  %v144_v25 = vld [vmem:[%s1734_s3 + $0xb0] sm:$0xff] }
   0x7   :  { %729 = vmatprep.subr.bf16.mxu1 %v728_v16  ;;  %v139_v26 = vld [vmem:[%s1734_s3 + $0x88] sm:$0xff]  ;;  %v146_v27 = vld [vmem:[%s1734_s3 + $0xc0] sm:$0xff]  ;;  %v732_v28 = vpack.c.bf16 %v144_v25, %v137_v24  ;;  %v136_v29 = vld [vmem:[%s1734_s3 + $0x70] sm:$0xff]  ;;  %v794_v32 = vpack.c.bf16 %v131_v23, %v124_v22 }
   0x8   :  { %731 = vmatpush1.bf16.msra.mxu1 %v730_v21  ;;  %v143_v30 = vld [vmem:[%s1734_s3 + $0xa8] sm:$0xff]  ;;  %v20_v31 = vld [vmem:[%s1735_s0] sm:$0xff]  ;;  %v796_v36 = vpack.c.bf16 %v146_v27, %v139_v26  ;;  %v145_v38 = vld [vmem:[%s1734_s3 + $0xb8] sm:$0xff] }
   0x9   :  { %727 = vmatpush1.bf16.msra.mxu0 %v726_v15  ;;  %v734_v33 = vpack.c.bf16 %v143_v30, %v136_v29  ;;  %v151_v34 = vld [vmem:[%s1734_s3 + $0xe8] sm:$0xff]  ;;  %v158_v35 = vld [vmem:[%s1734_s3 + $0x120] sm:$0xff]  ;;  %733 = vmatprep.subr.bf16.mxu1 %v732_v28  ;;  %v153_v41 = vld [vmem:[%s1734_s3 + $0xf8] sm:$0xff] }
   0xa   :  { %793 = vmatprep.subr.bf16.mxu0 %v792_v20  ;;  %v138_v37 = vld [vmem:[%s1734_s3 + $0x80] sm:$0xff]  ;;  %v736_v39 = vpack.c.bf16 %v158_v35, %v151_v34  ;;  %v160_v42 = vld [vmem:[%s1734_s3 + $0x130] sm:$0xff]  ;;  %v157_v43 = vld [vmem:[%s1734_s3 + $0x118] sm:$0xff] }
   0xb   :  { %v150_v40 = vld [vmem:[%s1734_s3 + $0xe0] sm:$0xff]  ;;  %v165_v45 = vld [vmem:[%s1734_s3 + $0x158] sm:$0xff]  ;;  %v172_v46 = vld [vmem:[%s1734_s3 + $0x190] sm:$0xff]  ;;  %v798_v47 = vpack.c.bf16 %v145_v38, %v138_v37  ;;  %v800_v51 = vpack.c.bf16 %v160_v42, %v153_v41 }
   0xc   :  { %684 = vmatmul.mubr.msk.f32.vlgmr.msra.gmra.mrb[0].mxu0 %vm41_vm0, %v20_v31  ;;  %735 = vmatpush1.bf16.msra.mxu1 %v734_v33  ;;  %v738_v44 = vpack.c.bf16 %v157_v43, %v150_v40  ;;  %v740_v48 = vpack.c.bf16 %v172_v46, %v165_v45  ;;  %v164_v49 = vld [vmem:[%s1734_s3 + $0x150] sm:$0xff]  ;;  %v171_v50 = vld [vmem:[%s1734_s3 + $0x188] sm:$0xff]  ;;  %v174_v56 = vld [vmem:[%s1734_s3 + $0x1a0] sm:$0xff] }
   0xd   :  { %795 = vmatpush1.bf16.msra.mxu0 %v794_v32  ;;  %737 = vmatprep.subr.bf16.mxu1 %v736_v39  ;;  %v152_v52 = vld [vmem:[%s1734_s3 + $0xf0] sm:$0xff]  ;;  %v159_v53 = vld [vmem:[%s1734_s3 + $0x128] sm:$0xff]  ;;  %v186_v57 = vld [vmem:[%s1734_s3 + $0x200] sm:$0xff]  ;;  %v742_v58 = vpack.c.bf16 %v171_v50, %v164_v49 }
   0xe   :  { %797 = vmatprep.subr.bf16.mxu0 %v796_v36  ;;  %v179_v54 = vld [vmem:[%s1734_s3 + $0x1c8] sm:$0xff]  ;;  %v802_v59 = vpack.c.bf16 %v159_v53, %v152_v52  ;;  %v166_v60 = vld [vmem:[%s1734_s3 + $0x160] sm:$0xff]  ;;  %v185_v63 = vld [vmem:[%s1734_s3 + $0x1f8] sm:$0xff] }
   0xf   :  { %v167_v55 = vld [vmem:[%s1734_s3 + $0x168] sm:$0xff]  ;;  %v744_v61 = vpack.c.bf16 %v186_v57, %v179_v54  ;;  %v178_v62 = vld [vmem:[%s1734_s3 + $0x1c0] sm:$0xff]  ;;  %v173_v1 = vld [vmem:[%s1734_s3 + $0x198] sm:$0xff] }
  0x10   :  { %739 = vmatpush1.bf16.msra.mxu1 %v738_v44  ;;  %v804_v0 = vpack.c.bf16 %v174_v56, %v167_v55  ;;  %v193_v2 = vld [vmem:[%s1734_s3 + $0x238] sm:$0xff]  ;;  %v200_v3 = vld [vmem:[%s1734_s3 + $0x270] sm:$0xff]  ;;  %v746_v6 = vpack.c.bf16 %v185_v63, %v178_v62  ;;  %v806_v7 = vpack.c.bf16 %v173_v1, %v166_v60  ;;  %v199_v11 = vld [vmem:[%s1734_s3 + $0x268] sm:$0xff] }
  0x11   :  { %799 = vmatpush1.bf16.msra.mxu0 %v798_v47  ;;  %741 = vmatprep.subr.bf16.mxu1 %v740_v48  ;;  %v181_v4 = vld [vmem:[%s1734_s3 + $0x1d8] sm:$0xff]  ;;  %v188_v5 = vld [vmem:[%s1734_s3 + $0x210] sm:$0xff]  ;;  %v748_v9 = vpack.c.bf16 %v200_v3, %v193_v2  ;;  %v187_v13 = vld [vmem:[%s1734_s3 + $0x208] sm:$0xff] }
  0x12   :  { %801 = vmatprep.subr.bf16.mxu0 %v800_v51  ;;  %v180_v8 = vld [vmem:[%s1734_s3 + $0x1d0] sm:$0xff]  ;;  %v808_v12 = vpack.c.bf16 %v188_v5, %v181_v4  ;;  %v207_v14 = vld [vmem:[%s1734_s3 + $0x2a8] sm:$0xff]  ;;  %v214_v15 = vld [vmem:[%s1734_s3 + $0x2e0] sm:$0xff] }
  0x13   :  { %v192_v10 = vld [vmem:[%s1734_s3 + $0x230] sm:$0xff]  ;;  %v195_v16 = vld [vmem:[%s1734_s3 + $0x248] sm:$0xff]  ;;  %v202_v17 = vld [vmem:[%s1734_s3 + $0x280] sm:$0xff]  ;;  %v810_v19 = vpack.c.bf16 %v187_v13, %v180_v8  ;;  %v752_v21 = vpack.c.bf16 %v214_v15, %v207_v14 }
  0x14   :  { %743 = vmatpush1.bf16.msra.mxu1 %v742_v58  ;;  %v750_v18 = vpack.c.bf16 %v199_v11, %v192_v10  ;;  %v194_v20 = vld [vmem:[%s1734_s3 + $0x240] sm:$0xff]  ;;  %v213_v23 = vld [vmem:[%s1734_s3 + $0x2d8] sm:$0xff]  ;;  %v812_v24 = vpack.c.bf16 %v202_v17, %v195_v16  ;;  %v228_v27 = vld [vmem:[%s1734_s3 + $0x350] sm:$0xff] }
  0x15   :  { %803 = vmatpush1.bf16.msra.mxu0 %v802_v59  ;;  %745 = vmatprep.subr.bf16.mxu1 %v744_v61  ;;  %v206_v22 = vld [vmem:[%s1734_s3 + $0x2a0] sm:$0xff]  ;;  %v201_v25 = vld [vmem:[%s1734_s3 + $0x278] sm:$0xff]  ;;  %v216_v29 = vld [vmem:[%s1734_s3 + $0x2f0] sm:$0xff] }
  0x16   :  { %805 = vmatprep.subr.bf16.mxu0 %v804_v0  ;;  %v221_v26 = vld [vmem:[%s1734_s3 + $0x318] sm:$0xff]  ;;  %v754_v30 = vpack.c.bf16 %v213_v23, %v206_v22  ;;  %v814_v31 = vpack.c.bf16 %v201_v25, %v194_v20  ;;  %v208_v32 = vld [vmem:[%s1734_s3 + $0x2b0] sm:$0xff]  ;;  %v227_v35 = vld [vmem:[%s1734_s3 + $0x348] sm:$0xff] }
  0x17   :  { %v209_v28 = vld [vmem:[%s1734_s3 + $0x2b8] sm:$0xff]  ;;  %v756_v33 = vpack.c.bf16 %v228_v27, %v221_v26  ;;  %v220_v34 = vld [vmem:[%s1734_s3 + $0x310] sm:$0xff]  ;;  %v215_v37 = vld [vmem:[%s1734_s3 + $0x2e8] sm:$0xff] }
  0x18   :  { %747 = vmatpush1.bf16.msra.mxu1 %v746_v6  ;;  %v816_v36 = vpack.c.bf16 %v216_v29, %v209_v28  ;;  %v235_v38 = vld [vmem:[%s1734_s3 + $0x388] sm:$0xff]  ;;  %v242_v39 = vld [vmem:[%s1734_s3 + $0x3c0] sm:$0xff]  ;;  %v758_v42 = vpack.c.bf16 %v227_v35, %v220_v34  ;;  %v818_v43 = vpack.c.bf16 %v215_v37, %v208_v32  ;;  %v241_v47 = vld [vmem:[%s1734_s3 + $0x3b8] sm:$0xff] }
  0x19   :  { %807 = vmatpush1.bf16.msra.mxu0 %v806_v7  ;;  %749 = vmatprep.subr.bf16.mxu1 %v748_v9  ;;  %v223_v40 = vld [vmem:[%s1734_s3 + $0x328] sm:$0xff]  ;;  %v230_v41 = vld [vmem:[%s1734_s3 + $0x360] sm:$0xff]  ;;  %v760_v45 = vpack.c.bf16 %v242_v39, %v235_v38  ;;  %v229_v49 = vld [vmem:[%s1734_s3 + $0x358] sm:$0xff] }
  0x1a   :  { %809 = vmatprep.subr.bf16.mxu0 %v808_v12  ;;  %v222_v44 = vld [vmem:[%s1734_s3 + $0x320] sm:$0xff]  ;;  %v820_v48 = vpack.c.bf16 %v230_v41, %v223_v40  ;;  %v249_v50 = vld [vmem:[%s1734_s3 + $0x3f8] sm:$0xff]  ;;  %v256_v51 = vld [vmem:[%s1734_s3 + $0x430] sm:$0xff] }
  0x1b   :  { %v234_v46 = vld [vmem:[%s1734_s3 + $0x380] sm:$0xff]  ;;  %v237_v52 = vld [vmem:[%s1734_s3 + $0x398] sm:$0xff]  ;;  %v244_v53 = vld [vmem:[%s1734_s3 + $0x3d0] sm:$0xff]  ;;  %v822_v55 = vpack.c.bf16 %v229_v49, %v222_v44  ;;  %v764_v57 = vpack.c.bf16 %v256_v51, %v249_v50 }
  0x1c   :  { %751 = vmatpush1.bf16.msra.mxu1 %v750_v18  ;;  %v762_v54 = vpack.c.bf16 %v241_v47, %v234_v46  ;;  %v236_v56 = vld [vmem:[%s1734_s3 + $0x390] sm:$0xff]  ;;  %v255_v59 = vld [vmem:[%s1734_s3 + $0x428] sm:$0xff]  ;;  %v824_v60 = vpack.c.bf16 %v244_v53, %v237_v52  ;;  %v270_v63 = vld [vmem:[%s1734_s3 + $0x4a0] sm:$0xff] }
  0x1d   :  { %811 = vmatpush1.bf16.msra.mxu0 %v810_v19  ;;  %753 = vmatprep.subr.bf16.mxu1 %v752_v21  ;;  %v248_v58 = vld [vmem:[%s1734_s3 + $0x3f0] sm:$0xff]  ;;  %v243_v61 = vld [vmem:[%s1734_s3 + $0x3c8] sm:$0xff]  ;;  %v258_v1 = vld [vmem:[%s1734_s3 + $0x440] sm:$0xff] }
  0x1e   :  { %813 = vmatprep.subr.bf16.mxu0 %v812_v24  ;;  %v263_v62 = vld [vmem:[%s1734_s3 + $0x468] sm:$0xff]  ;;  %v766_v2 = vpack.c.bf16 %v255_v59, %v248_v58  ;;  %v826_v3 = vpack.c.bf16 %v243_v61, %v236_v56  ;;  %v250_v4 = vld [vmem:[%s1734_s3 + $0x400] sm:$0xff]  ;;  %v269_v7 = vld [vmem:[%s1734_s3 + $0x498] sm:$0xff] }
  0x1f   :  { %v251_v0 = vld [vmem:[%s1734_s3 + $0x408] sm:$0xff]  ;;  %v768_v5 = vpack.c.bf16 %v270_v63, %v263_v62  ;;  %v262_v6 = vld [vmem:[%s1734_s3 + $0x460] sm:$0xff]  ;;  %v257_v9 = vld [vmem:[%s1734_s3 + $0x438] sm:$0xff] }
  0x20   :  { %755 = vmatpush1.bf16.msra.mxu1 %v754_v30  ;;  %v828_v8 = vpack.c.bf16 %v258_v1, %v251_v0  ;;  %v277_v10 = vld [vmem:[%s1734_s3 + $0x4d8] sm:$0xff]  ;;  %v284_v11 = vld [vmem:[%s1734_s3 + $0x510] sm:$0xff]  ;;  %v770_v14 = vpack.c.bf16 %v269_v7, %v262_v6  ;;  %v830_v15 = vpack.c.bf16 %v257_v9, %v250_v4  ;;  %v283_v19 = vld [vmem:[%s1734_s3 + $0x508] sm:$0xff] }
  0x21   :  { %815 = vmatpush1.bf16.msra.mxu0 %v814_v31  ;;  %757 = vmatprep.subr.bf16.mxu1 %v756_v33  ;;  %v265_v12 = vld [vmem:[%s1734_s3 + $0x478] sm:$0xff]  ;;  %v272_v13 = vld [vmem:[%s1734_s3 + $0x4b0] sm:$0xff]  ;;  %v772_v17 = vpack.c.bf16 %v284_v11, %v277_v10  ;;  %v271_v21 = vld [vmem:[%s1734_s3 + $0x4a8] sm:$0xff] }
  0x22   :  { %817 = vmatprep.subr.bf16.mxu0 %v816_v36  ;;  %v264_v16 = vld [vmem:[%s1734_s3 + $0x470] sm:$0xff]  ;;  %v832_v20 = vpack.c.bf16 %v272_v13, %v265_v12  ;;  %v291_v22 = vld [vmem:[%s1734_s3 + $0x548] sm:$0xff]  ;;  %v298_v23 = vld [vmem:[%s1734_s3 + $0x580] sm:$0xff] }
  0x23   :  { %v276_v18 = vld [vmem:[%s1734_s3 + $0x4d0] sm:$0xff]  ;;  %v279_v24 = vld [vmem:[%s1734_s3 + $0x4e8] sm:$0xff]  ;;  %v286_v25 = vld [vmem:[%s1734_s3 + $0x520] sm:$0xff]  ;;  %v834_v27 = vpack.c.bf16 %v271_v21, %v264_v16  ;;  %v776_v29 = vpack.c.bf16 %v298_v23, %v291_v22 }
  0x24   :  { %759 = vmatpush1.bf16.msra.mxu1 %v758_v42  ;;  %v774_v26 = vpack.c.bf16 %v283_v19, %v276_v18  ;;  %v278_v28 = vld [vmem:[%s1734_s3 + $0x4e0] sm:$0xff]  ;;  %v297_v31 = vld [vmem:[%s1734_s3 + $0x578] sm:$0xff]  ;;  %v836_v32 = vpack.c.bf16 %v286_v25, %v279_v24  ;;  %v312_v35 = vld [vmem:[%s1734_s3 + $0x5f0] sm:$0xff] }
  0x25   :  { %819 = vmatpush1.bf16.msra.mxu0 %v818_v43  ;;  %761 = vmatprep.subr.bf16.mxu1 %v760_v45  ;;  %v290_v30 = vld [vmem:[%s1734_s3 + $0x540] sm:$0xff]  ;;  %v285_v33 = vld [vmem:[%s1734_s3 + $0x518] sm:$0xff]  ;;  %v300_v37 = vld [vmem:[%s1734_s3 + $0x590] sm:$0xff] }
  0x26   :  { %821 = vmatprep.subr.bf16.mxu0 %v820_v48  ;;  %v305_v34 = vld [vmem:[%s1734_s3 + $0x5b8] sm:$0xff]  ;;  %v778_v38 = vpack.c.bf16 %v297_v31, %v290_v30  ;;  %v838_v39 = vpack.c.bf16 %v285_v33, %v278_v28  ;;  %v292_v40 = vld [vmem:[%s1734_s3 + $0x550] sm:$0xff]  ;;  %v311_v43 = vld [vmem:[%s1734_s3 + $0x5e8] sm:$0xff] }
  0x27   :  { %v293_v36 = vld [vmem:[%s1734_s3 + $0x558] sm:$0xff]  ;;  %v780_v41 = vpack.c.bf16 %v312_v35, %v305_v34  ;;  %v304_v42 = vld [vmem:[%s1734_s3 + $0x5b0] sm:$0xff]  ;;  %v299_v45 = vld [vmem:[%s1734_s3 + $0x588] sm:$0xff] }
  0x28   :  { %763 = vmatpush1.bf16.msra.mxu1 %v762_v54  ;;  %v840_v44 = vpack.c.bf16 %v300_v37, %v293_v36  ;;  %v319_v46 = vld [vmem:[%s1734_s3 + $0x628] sm:$0xff]  ;;  %v326_v47 = vld [vmem:[%s1734_s3 + $0x660] sm:$0xff]  ;;  %v782_v50 = vpack.c.bf16 %v311_v43, %v304_v42  ;;  %v842_v51 = vpack.c.bf16 %v299_v45, %v292_v40  ;;  %v325_v54 = vld [vmem:[%s1734_s3 + $0x658] sm:$0xff] }
  0x29   :  { %823 = vmatpush1.bf16.msra.mxu0 %v822_v55  ;;  %765 = vmatprep.subr.bf16.mxu1 %v764_v57  ;;  %v307_v48 = vld [vmem:[%s1734_s3 + $0x5c8] sm:$0xff]  ;;  %v314_v49 = vld [vmem:[%s1734_s3 + $0x600] sm:$0xff]  ;;  %v784_v52 = vpack.c.bf16 %v326_v47, %v319_v46  ;;  %v313_v57 = vld [vmem:[%s1734_s3 + $0x5f8] sm:$0xff] }
  0x2a   :  { %825 = vmatprep.subr.bf16.mxu0 %v824_v60  ;;  %v318_v53 = vld [vmem:[%s1734_s3 + $0x620] sm:$0xff]  ;;  %v844_v55 = vpack.c.bf16 %v314_v49, %v307_v48  ;;  %v321_v58 = vld [vmem:[%s1734_s3 + $0x638] sm:$0xff]  ;;  %v328_v59 = vld [vmem:[%s1734_s3 + $0x670] sm:$0xff] }
  0x2b   :  { %v306_v56 = vld [vmem:[%s1734_s3 + $0x5c0] sm:$0xff]  ;;  %v786_v60 = vpack.c.bf16 %v325_v54, %v318_v53  ;;  %v848_v62 = vpack.c.bf16 %v328_v59, %v321_v58  ;;  %v320_v63 = vld [vmem:[%s1734_s3 + $0x630] sm:$0xff]  ;;  %v327_v0 = vld [vmem:[%s1734_s3 + $0x668] sm:$0xff] }
  0x2c   :  { %767 = vmatpush1.bf16.msra.mxu1 %v766_v2  ;;  %v846_v61 = vpack.c.bf16 %v313_v57, %v306_v56  ;;  %v850_v1 = vpack.c.bf16 %v327_v0, %v320_v63  ;;  %v333_v2 = vld [vmem:[%s1734_s3 + $0x698] sm:$0xff]  ;;  %v335_v4 = vld [vmem:[%s1734_s3 + $0x6a8] sm:$0xff]  ;;  %v342_v6 = vld [vmem:[%s1734_s3 + $0x6e0] sm:$0xff] }
  0x2d   :  { %827 = vmatpush1.bf16.msra.mxu0 %v826_v3  ;;  %769 = vmatprep.subr.bf16.mxu1 %v768_v5  ;;  %v340_v3 = vld [vmem:[%s1734_s3 + $0x6d0] sm:$0xff]  ;;  %v852_v9 = vpack.c.bf16 %v342_v6, %v335_v4  ;;  %v334_v11 = vld [vmem:[%s1734_s3 + $0x6a0] sm:$0xff]  ;;  %v341_v12 = vld [vmem:[%s1734_s3 + $0x6d8] sm:$0xff] }
  0x2e   :  { %829 = vmatprep.subr.bf16.mxu0 %v828_v8  ;;  %v788_v5 = vpack.c.bf16 %v340_v3, %v333_v2  ;;  %v332_v7 = vld [vmem:[%s1734_s3 + $0x690] sm:$0xff]  ;;  %v339_v8 = vld [vmem:[%s1734_s3 + $0x6c8] sm:$0xff]  ;;  %v854_v13 = vpack.c.bf16 %v341_v12, %v334_v11  ;;  %v29_v23 = vld [vmem:[%s1736_s2] sm:$0x3] }
  0x2f   :  { %v790_v10 = vpack.c.bf16 %v339_v8, %v332_v7  ;;  %v240_v16 = vld [vmem:[%s1734_s3 + $0x3b0] sm:$0xff]  ;;  %v247_v18 = vld [vmem:[%s1734_s3 + $0x3e8] sm:$0xff]  ;;  %v126_v28 = vld [vmem:[%s1734_s3 + $0x20] sm:$0xff] }
  0x30   :  { %771 = vmatpush1.bf16.msra.mxu1 %v770_v14  ;;  %v127_v14 = vld [vmem:[%s1734_s3 + $0x28] sm:$0xff]  ;;  %v920_v19 = vpack.c.bf16 %v247_v18, %v240_v16  ;;  %v133_v31 = vld [vmem:[%s1734_s3 + $0x58] sm:$0xff]  ;;  %v148_v36 = vld [vmem:[%s1734_s3 + $0xd0] sm:$0xff] }
  0x31   :  { %831 = vmatpush1.bf16.msra.mxu0 %v830_v15  ;;  %773 = vmatprep.subr.bf16.mxu1 %v772_v17  ;;  %v134_v15 = vld [vmem:[%s1734_s3 + $0x60] sm:$0xff]  ;;  %v135_v33 = vld [vmem:[%s1734_s3 + $0x68] sm:$0xff]  ;;  %v141_v35 = vld [vmem:[%s1734_s3 + $0x98] sm:$0xff]  ;;  %v858_v40 = vpack.c.bf16 %v133_v31, %v126_v28 }
  0x32   :  { %833 = vmatprep.subr.bf16.mxu0 %v832_v20  ;;  %v856_v17 = vpack.c.bf16 %v134_v15, %v127_v14  ;;  %v31_v20 = vlaneseq  ;;  %v254_v37 = vld [vmem:[%s1734_s3 + $0x420] sm:$0xff]  ;;  %v140_v42 = vld [vmem:[%s1734_s3 + $0x90] sm:$0xff]  ;;  %v147_v43 = vld [vmem:[%s1734_s3 + $0xc8] sm:$0xff]  ;;  %v860_v48 = vpack.c.bf16 %v148_v36, %v141_v35 }
  0x33   :  { %v142_v45 = vld [vmem:[%s1734_s3 + $0xa0] sm:$0xff]  ;;  %v149_v46 = vld [vmem:[%s1734_s3 + $0xd8] sm:$0xff]  ;;  %v155_v47 = vld [vmem:[%s1734_s3 + $0x108] sm:$0xff]  ;;  %v862_v53 = vpack.c.bf16 %v147_v43, %v140_v42 }
  0x34   :  { %775 = vmatpush1.bf16.msra.mxu1 %v774_v26  ;;  %v1407_v21 = vshrl.u32 %v31_v20, 7  ;;  %v926_v54 = vpack.c.bf16 %v149_v46, %v142_v45  ;;  %v161_v56 = vld [vmem:[%s1734_s3 + $0x138] sm:$0xff]  ;;  %v156_v59 = vld [vmem:[%s1734_s3 + $0x110] sm:$0xff]  ;;  %v282_v63 = vld [vmem:[%s1734_s3 + $0x500] sm:$0xff] }
  0x35   :  { %835 = vmatpush1.bf16.msra.mxu0 %v834_v27  ;;  %777 = vmatprep.subr.bf16.mxu1 %v776_v29  ;;  %v289_v0 = vld [vmem:[%s1734_s3 + $0x538] sm:$0xff]  ;;  %v168_v3 = vld [vmem:[%s1734_s3 + $0x170] sm:$0xff]  ;;  %v175_v4 = vld [vmem:[%s1734_s3 + $0x1a8] sm:$0xff] }
  0x36   :  { %837 = vmatprep.subr.bf16.mxu0 %v836_v32  ;;  %v33_v22 = vsub.s32 0, %v1407_v21  ;;  %v37_v24 = vsub.s32 1, %v1407_v21  ;;  %v128_v32 = vld [vmem:[%s1734_s3 + $0x30] sm:$0xff]  ;;  %v932_v6 = vpack.c.bf16 %v289_v0, %v282_v63  ;;  %v170_v7 = vld [vmem:[%s1734_s3 + $0x180] sm:$0xff]  ;;  %v177_v8 = vld [vmem:[%s1734_s3 + $0x1b8] sm:$0xff] }
  0x37   :  { %v296_v11 = vld [vmem:[%s1734_s3 + $0x570] sm:$0xff]  ;;  %v303_v12 = vld [vmem:[%s1734_s3 + $0x5a8] sm:$0xff]  ;;  %v934_v14 = vpack.c.bf16 %v177_v8, %v170_v7  ;;  %v182_v15 = vld [vmem:[%s1734_s3 + $0x1e0] sm:$0xff] }
  0x38   :  { %779 = vmatpush1.bf16.msra.mxu1 %v778_v38  ;;  %v34_v25 = vrot.slane %v29_v23, %v33_v22  ;;  %v38_v26 = vrot.slane %v29_v23, %v37_v24  ;;  %v261_v38 = vld [vmem:[%s1734_s3 + $0x458] sm:$0xff]  ;;  %v936_v18 = vpack.c.bf16 %v303_v12, %v296_v11  ;;  %v191_v20 = vld [vmem:[%s1734_s3 + $0x228] sm:$0xff]  ;;  %v210_v42 = vld [vmem:[%s1734_s3 + $0x2c0] sm:$0xff] }
  0x39   :  { %839 = vmatpush1.bf16.msra.mxu0 %v838_v39  ;;  %781 = vmatprep.subr.bf16.mxu1 %v780_v41  ;;  %v922_v41 = vpack.c.bf16 %v135_v33, %v128_v32  ;;  %v924_v49 = vpack.c.bf16 %v261_v38, %v254_v37  ;;  %v189_v16 = vld [vmem:[%s1734_s3 + $0x218] sm:$0xff]  ;;  %v203_v31 = vld [vmem:[%s1734_s3 + $0x288] sm:$0xff]  ;;  %v218_v37 = vld [vmem:[%s1734_s3 + $0x300] sm:$0xff] }
  0x3a   :  { %841 = vmatprep.subr.bf16.mxu0 %v840_v44  ;;  %v197_v23 = vld [vmem:[%s1734_s3 + $0x258] sm:$0xff]  ;;  %v874_v28 = vpack.c.bf16 %v189_v16, %v182_v15  ;;  %v211_v36 = vld [vmem:[%s1734_s3 + $0x2c8] sm:$0xff]  ;;  %v324_v38 = vld [vmem:[%s1734_s3 + $0x650] sm:$0xff] }
  0x3b   :  { %v205_v35 = vld [vmem:[%s1734_s3 + $0x298] sm:$0xff]  ;;  %v880_v45 = vpack.c.bf16 %v218_v37, %v211_v36  ;;  %v252_v8 = vld [vmem:[%s1734_s3 + $0x410] sm:$0xff]  ;;  %v274_v11 = vld [vmem:[%s1734_s3 + $0x4c0] sm:$0xff] }
  0x3c   :  { %783 = vmatpush1.bf16.msra.mxu1 %v782_v50  ;;  %v162_v50 = vld [vmem:[%s1734_s3 + $0x140] sm:$0xff]  ;;  %v217_v43 = vld [vmem:[%s1734_s3 + $0x2f8] sm:$0xff]  ;;  %v315_v36 = vld [vmem:[%s1734_s3 + $0x608] sm:$0xff] }
  0x3d   :  { %843 = vmatpush1.bf16.msra.mxu0 %v842_v51  ;;  %785 = vmatprep.subr.bf16.mxu1 %v784_v52  ;;  %v268_v51 = vld [vmem:[%s1734_s3 + $0x490] sm:$0xff]  ;;  %v275_v52 = vld [vmem:[%s1734_s3 + $0x4c8] sm:$0xff]  ;;  %v864_v57 = vpack.c.bf16 %v162_v50, %v155_v47  ;;  %v273_v15 = vld [vmem:[%s1734_s3 + $0x4b8] sm:$0xff] }
  0x3e   :  { %845 = vmatprep.subr.bf16.mxu0 %v844_v55  ;;  %v154_v55 = vld [vmem:[%s1734_s3 + $0x100] sm:$0xff]  ;;  %v928_v58 = vpack.c.bf16 %v275_v52, %v268_v51  ;;  %v212_v47 = vld [vmem:[%s1734_s3 + $0x2d0] sm:$0xff]  ;;  %v345_v52 = vld [vmem:[%s1734_s3 + $0x6f8] sm:$0xff] }
  0x3f   :  { %v232_v50 = vld [vmem:[%s1734_s3 + $0x370] sm:$0xff]  ;;  %v338_v51 = vld [vmem:[%s1734_s3 + $0x6c0] sm:$0xff]  ;;  %v281_v16 = vld [vmem:[%s1734_s3 + $0x4f8] sm:$0xff] }
  0x40   :  { %787 = vmatpush1.bf16.msra.mxu1 %v786_v60  ;;  %v163_v60 = vld [vmem:[%s1734_s3 + $0x148] sm:$0xff] }
  0x41   :  { %847 = vmatpush1.bf16.msra.mxu0 %v846_v61  ;;  %789 = vmatprep.subr.bf16.mxu1 %v788_v5  ;;  %v169_v61 = vld [vmem:[%s1734_s3 + $0x178] sm:$0xff]  ;;  %v930_v2 = vpack.c.bf16 %v163_v60, %v156_v59  ;;  %v226_v59 = vld [vmem:[%s1734_s3 + $0x340] sm:$0xff]  ;;  %v323_v37 = vld [vmem:[%s1734_s3 + $0x648] sm:$0xff] }
  0x42   :  { %849 = vmatprep.subr.bf16.mxu0 %v848_v62  ;;  %v176_v62 = vld [vmem:[%s1734_s3 + $0x1b0] sm:$0xff]  ;;  %v233_v60 = vld [vmem:[%s1734_s3 + $0x378] sm:$0xff] }
  0x43   :  { %v868_v5 = vpack.c.bf16 %v176_v62, %v169_v61  ;;  %v239_v61 = vld [vmem:[%s1734_s3 + $0x3a8] sm:$0xff]  ;;  %v246_v62 = vld [vmem:[%s1734_s3 + $0x3e0] sm:$0xff]  ;;  %v950_v0 = vpack.c.bf16 %v233_v60, %v226_v59 }
  0x44   :  { %791 = vmatpush1.bf16.msra.mxu1 %v790_v10  ;;  %v190_v10 = vld [vmem:[%s1734_s3 + $0x220] sm:$0xff] }
  0x45   :  { %851 = vmatpush1.bf16.msra.mxu0 %v850_v1  ;;  %857 = vmatprep.subr.bf16.mxu1 %v856_v17  ;;  %v866_v1 = vpack.c.bf16 %v161_v56, %v154_v55  ;;  %v224_v55 = vld [vmem:[%s1734_s3 + $0x330] sm:$0xff] }
  0x46   :  { %853 = vmatprep.subr.bf16.mxu0 %v852_v9  ;;  %v183_v9 = vld [vmem:[%s1734_s3 + $0x1e8] sm:$0xff] }
  0x47   :  { %v872_v17 = vpack.c.bf16 %v190_v10, %v183_v9  ;;  %v259_v9 = vld [vmem:[%s1734_s3 + $0x448] sm:$0xff] }
  0x48   :  { %v267_v10 = vld [vmem:[%s1734_s3 + $0x488] sm:$0xff]  ;;  %v894_v12 = vpack.c.bf16 %v259_v9, %v252_v8 }
  0x49   :  { %855 = vmatpush1.bf16.msra.mxu0 %v854_v13  ;;  %v870_v13 = vpack.c.bf16 %v175_v4, %v168_v3  ;;  %v245_v3 = vld [vmem:[%s1734_s3 + $0x3d8] sm:$0xff] }
  0x4a   :  { %921 = vmatprep.subr.bf16.mxu0 %v920_v19  ;;  %v184_v19 = vld [vmem:[%s1734_s3 + $0x1f0] sm:$0xff]  ;;  %v253_v4 = vld [vmem:[%s1734_s3 + $0x418] sm:$0xff] }
  0xdf   :  { %v111_v27 = vpop.f32.mrb[0].mxu0 }
  0xe0   :  { %v112_v29 = vadd.f32 %v111_v27, %v34_v25  ;;  %v113_v30 = vpop.f32.mrb[1].mxu0  ;;  %v204_v25 = vld [vmem:[%s1734_s3 + $0x290] sm:$0xff]  ;;  %v317_v27 = vld [vmem:[%s1734_s3 + $0x618] sm:$0xff] }
  0xe1   :  { %v114_v34 = vadd.f32 %v113_v30, %v38_v26  ;;  %v310_v26 = vld [vmem:[%s1734_s3 + $0x5e0] sm:$0xff]  ;;  %v196_v30 = vld [vmem:[%s1734_s3 + $0x250] sm:$0xff]  ;;  %v876_v32 = vpack.c.bf16 %v204_v25, %v197_v23  ;;  %v287_v23 = vld [vmem:[%s1734_s3 + $0x528] sm:$0xff] }
  0xe2   :  { %v1448_v44 = vmax.f32 %v112_v29, 0.0  ;;  %v938_v29 = vpack.c.bf16 %v191_v20, %v184_v19  ;;  %v940_v33 = vpack.c.bf16 %v317_v27, %v310_v26  ;;  %v280_v20 = vld [vmem:[%s1734_s3 + $0x4f0] sm:$0xff]  ;;  %v295_v25 = vld [vmem:[%s1734_s3 + $0x568] sm:$0xff]  ;;  %v302_v26 = vld [vmem:[%s1734_s3 + $0x5a0] sm:$0xff] }
  0xe3   :  { %v117_v39 = vmax.f32 %v114_v34, 0.0  ;;  %v198_v34 = vld [vmem:[%s1734_s3 + $0x260] sm:$0xff]  ;;  %v902_v27 = vpack.c.bf16 %v287_v23, %v280_v20 }
  0xe5   :  { %447 = vmatprep.mubr.f32.mxu1 %v117_v39  ;;  %518 = vmatprep.mubr.f32.mxu0 %v117_v39 }
  0xe6   :  { %448 = vmatmul.mubr.f32.vlgmr.msra.gmra.mrb[0].mxu1 %v1448_v44  ;;  %519 = vmatmul.mubr.f32.vlgmr.msra.gmra.mrb[2].mxu0 %v1448_v44 }
  0xe7   :  { %859 = vmatpush1.bf16.msra.mxu1 %v858_v40  ;;  %923 = vmatpush3.bf16.msra.mxu0 %v922_v41  ;;  %v878_v40 = vpack.c.bf16 %v203_v31, %v196_v30  ;;  %v942_v41 = vpack.c.bf16 %v205_v35, %v198_v34  ;;  %v301_v30 = vld [vmem:[%s1734_s3 + $0x598] sm:$0xff]  ;;  %v308_v35 = vld [vmem:[%s1734_s3 + $0x5d0] sm:$0xff] }
  0xe8   :  { %589 = vmatprep.mubr.f32.mxu1 %v117_v39  ;;  %660 = vmatprep.mubr.f32.mxu0 %v117_v39  ;;  %v331_v39 = vld [vmem:[%s1734_s3 + $0x688] sm:$0xff]  ;;  %v309_v31 = vld [vmem:[%s1734_s3 + $0x5d8] sm:$0xff] }
  0xe9   :  { %861 = vmatprep.subr.bf16.mxu1 %v860_v48  ;;  %925 = vmatprep.subr.bf16.mxu0 %v924_v49  ;;  %v944_v46 = vpack.c.bf16 %v331_v39, %v324_v38  ;;  %v219_v48 = vld [vmem:[%s1734_s3 + $0x308] sm:$0xff]  ;;  %v225_v49 = vld [vmem:[%s1734_s3 + $0x338] sm:$0xff]  ;;  %v330_v38 = vld [vmem:[%s1734_s3 + $0x680] sm:$0xff]  ;;  %v910_v39 = vpack.c.bf16 %v315_v36, %v308_v35 }
  0xea   :  { %v884_v56 = vpack.c.bf16 %v232_v50, %v225_v49  ;;  %v343_v49 = vld [vmem:[%s1734_s3 + $0x6e8] sm:$0xff] }
  0xeb   :  { %863 = vmatpush1.bf16.msra.mxu1 %v862_v53  ;;  %927 = vmatpush3.bf16.msra.mxu0 %v926_v54  ;;  %v882_v53 = vpack.c.bf16 %v217_v43, %v210_v42  ;;  %v946_v54 = vpack.c.bf16 %v219_v48, %v212_v47  ;;  %v329_v42 = vld [vmem:[%s1734_s3 + $0x678] sm:$0xff]  ;;  %v336_v48 = vld [vmem:[%s1734_s3 + $0x6b0] sm:$0xff] }
  0xec   :  { %865 = vmatprep.subr.bf16.mxu1 %v864_v57  ;;  %929 = vmatprep.subr.bf16.mxu0 %v928_v58  ;;  %v948_v57 = vpack.c.bf16 %v345_v52, %v338_v51  ;;  %v231_v58 = vld [vmem:[%s1734_s3 + $0x368] sm:$0xff]  ;;  %v337_v43 = vld [vmem:[%s1734_s3 + $0x6b8] sm:$0xff]  ;;  %v918_v50 = vpack.c.bf16 %v343_v49, %v336_v48  ;;  %v358_v51 = vsub.s32 2, %v1407_v21  ;;  %v346_v52 = vld [vmem:[%s1737_s4] sm:$0xff] }
  0xed   :  { %v886_v63 = vpack.c.bf16 %v231_v58, %v224_v55 }
  0xee   :  { %v359_v55 = vrot.slane %v346_v52, %v358_v51 }
  0xef   :  { %867 = vmatpush1.bf16.msra.mxu1 %v866_v1  ;;  %931 = vmatpush3.bf16.msra.mxu0 %v930_v2  ;;  %v888_v1 = vpack.c.bf16 %v246_v62, %v239_v61  ;;  %v238_v2 = vld [vmem:[%s1734_s3 + $0x3a0] sm:$0xff] }
  0xf0   :  { %869 = vmatprep.subr.bf16.mxu1 %v868_v5  ;;  %933 = vmatprep.subr.bf16.mxu0 %v932_v6  ;;  %v260_v5 = vld [vmem:[%s1734_s3 + $0x450] sm:$0xff]  ;;  %v890_v6 = vpack.c.bf16 %v245_v3, %v238_v2 }
  0xf1   :  { %v892_v7 = vpack.c.bf16 %v260_v5, %v253_v4 }
  0xf3   :  { %871 = vmatpush1.bf16.msra.mxu1 %v870_v13  ;;  %935 = vmatpush3.bf16.msra.mxu0 %v934_v14  ;;  %v896_v13 = vpack.c.bf16 %v274_v11, %v267_v10  ;;  %v266_v14 = vld [vmem:[%s1734_s3 + $0x480] sm:$0xff]  ;;  %v366_v10 = vsub.s32 4, %v1407_v21  ;;  %v370_v11 = vsub.s32 5, %v1407_v21 }
  0xf4   :  { %873 = vmatprep.subr.bf16.mxu1 %v872_v17  ;;  %937 = vmatprep.subr.bf16.mxu0 %v936_v18  ;;  %v288_v17 = vld [vmem:[%s1734_s3 + $0x530] sm:$0xff]  ;;  %v898_v18 = vpack.c.bf16 %v273_v15, %v266_v14 }
  0xf5   :  { %v900_v19 = vpack.c.bf16 %v288_v17, %v281_v16 }
  0xf7   :  { %875 = vmatpush1.bf16.msra.mxu1 %v874_v28  ;;  %939 = vmatpush3.bf16.msra.mxu0 %v938_v29  ;;  %v904_v28 = vpack.c.bf16 %v302_v26, %v295_v25  ;;  %v294_v29 = vld [vmem:[%s1734_s3 + $0x560] sm:$0xff] }
  0xf8   :  { %877 = vmatprep.subr.bf16.mxu1 %v876_v32  ;;  %941 = vmatprep.subr.bf16.mxu0 %v940_v33  ;;  %v316_v32 = vld [vmem:[%s1734_s3 + $0x610] sm:$0xff]  ;;  %v906_v33 = vpack.c.bf16 %v301_v30, %v294_v29 }
  0xf9   :  { %v908_v34 = vpack.c.bf16 %v316_v32, %v309_v31 }
  0xfb   :  { %879 = vmatpush1.bf16.msra.mxu1 %v878_v40  ;;  %943 = vmatpush3.bf16.msra.mxu0 %v942_v41  ;;  %v912_v40 = vpack.c.bf16 %v330_v38, %v323_v37  ;;  %v322_v41 = vld [vmem:[%s1734_s3 + $0x640] sm:$0xff] }
  0xfc   :  { %881 = vmatprep.subr.bf16.mxu1 %v880_v45  ;;  %945 = vmatprep.subr.bf16.mxu0 %v944_v46  ;;  %v344_v45 = vld [vmem:[%s1734_s3 + $0x6f0] sm:$0xff]  ;;  %v914_v46 = vpack.c.bf16 %v329_v42, %v322_v41 }
  0xfd   :  { %v916_v47 = vpack.c.bf16 %v344_v45, %v337_v43 }
  0xff   :  { %883 = vmatpush1.bf16.msra.mxu1 %v882_v53  ;;  %947 = vmatpush3.bf16.msra.mxu0 %v946_v54  ;;  %v362_v53 = vsub.s32 3, %v1407_v21  ;;  %v351_v54 = vrot.slane %v346_v52, %v33_v22  ;;  %v374_v22 = vsub.s32 6, %v1407_v21 }
 0x100   :  { %885 = vmatprep.subr.bf16.mxu1 %v884_v56  ;;  %949 = vmatprep.subr.bf16.mxu0 %v948_v57  ;;  %v355_v56 = vrot.slane %v346_v52, %v37_v24 }
 0x101   :  { %v363_v57 = vrot.slane %v346_v52, %v362_v53  ;;  %v375_v5 = vrot.slane %v346_v52, %v374_v22 }
 0x103   :  { %887 = vmatpush1.bf16.msra.mxu1 %v886_v63  ;;  %951 = vmatpush3.bf16.msra.mxu0 %v950_v0 }
 0x104   :  { %889 = vmatprep.subr.bf16.mxu1 %v888_v1 }
 0x106   :  { %661 = vmatmul.mubr.f32.vlgmr.msra.gmra.mrb[4].mxu0 %v1448_v44 }
 0x107   :  { %891 = vmatpush1.bf16.msra.mxu1 %v890_v6 }
 0x108   :  { %893 = vmatprep.subr.bf16.mxu1 %v892_v7 }
 0x10b   :  { %895 = vmatpush1.bf16.msra.mxu1 %v894_v12  ;;  %v367_v12 = vrot.slane %v346_v52, %v366_v10 }
 0x10c   :  { %897 = vmatprep.subr.bf16.mxu1 %v896_v13  ;;  %v371_v13 = vrot.slane %v346_v52, %v370_v11 }
 0x10f   :  { %899 = vmatpush1.bf16.msra.mxu1 %v898_v18 }
 0x110   :  { %901 = vmatprep.subr.bf16.mxu1 %v900_v19 }
 0x113   :  { %903 = vmatpush1.bf16.msra.mxu1 %v902_v27 }
 0x114   :  { %905 = vmatprep.subr.bf16.mxu1 %v904_v28 }
 0x117   :  { %907 = vmatpush1.bf16.msra.mxu1 %v906_v33 }
 0x118   :  { %909 = vmatprep.subr.bf16.mxu1 %v908_v34 }
 0x11b   :  { %911 = vmatpush1.bf16.msra.mxu1 %v910_v39 }
 0x11c   :  { %913 = vmatprep.subr.bf16.mxu1 %v912_v40 }
 0x11f   :  { %915 = vmatpush1.bf16.msra.mxu1 %v914_v46 }
 0x120   :  { %917 = vmatprep.subr.bf16.mxu1 %v916_v47 }
 0x123   :  { %919 = vmatpush1.bf16.msra.mxu1 %v918_v50 }
 0x126   :  { %590 = vmatmul.mubr.f32.vlgmr.msra.gmra.mrb[2].mxu1 %v1448_v44 }
 0x1b9   :  { %v449_v58 = vpop.f32.mrb[0].mxu1  ;;  %v520_v59 = vpop.f32.mrb[2].mxu0 }
 0x1ba   :  { %v450_v60 = vadd.f32 %v449_v58, %v351_v54  ;;  %v521_v44 = vadd.f32 %v520_v59, %v359_v55  ;;  %v451_v61 = vpop.f32.mrb[1].mxu1  ;;  %v522_v62 = vpop.f32.mrb[3].mxu0 }
 0x1bb   :  { %v452_v63 = vadd.f32 %v451_v61, %v355_v56  ;;  %v523_v0 = vadd.f32 %v522_v62, %v363_v57 }
 0x1bc   :  { %v666_v1 = vmax.f32 %v450_v60, 0.0  ;;  %v668_v2 = vmax.f32 %v521_v44, 0.0 }
 0x1bd   :  { %v667_v3 = vmax.f32 %v452_v63, 0.0  ;;  %v669_v4 = vmax.f32 %v523_v0, 0.0 }
 0x1be   :  { %673 = vst [vmem:[%s1738_s5] sm:$0xff] %v666_v1  ;;  %675 = vst [vmem:[%s1738_s5 + $0x10] sm:$0xff] %v668_v2 }
 0x1bf   :  { %674 = vst [vmem:[%s1738_s5 + $0x8] sm:$0xff] %v667_v3  ;;  %676 = vst [vmem:[%s1738_s5 + $0x18] sm:$0xff] %v669_v4 }
 0x1d9   :  { %v717_v24 = vpop.f32.mrb[4].mxu0 }
 0x1da   :  { %v718_v6 = vpop.f32.mrb[5].mxu0 }
 0x1db   :  { %v719_v7 = vadd.f32 %v718_v6, %v717_v24 }
 0x1dd   :  { %v663_v8 = vadd.f32 %v719_v7, %v375_v5 }
 0x1df   :  { %v672_v9 = vmax.f32 %v663_v8, 0.0 }
 0x1e1   :  { %679 = vst [vmem:[%s1738_s5 + $0x30] sm:$0xff] %v672_v9 }
 0x1f9   :  { %v591_v14 = vpop.f32.mrb[2].mxu1 }
 0x1fa   :  { %v592_v15 = vadd.f32 %v591_v14, %v367_v12  ;;  %v593_v16 = vpop.f32.mrb[3].mxu1 }
 0x1fb   :  { %v594_v17 = vadd.f32 %v593_v16, %v371_v13 }
 0x1fc   :  { %v670_v18 = vmax.f32 %v592_v15, 0.0 }
 0x1fd   :  { %v671_v19 = vmax.f32 %v594_v17, 0.0 }
 0x1fe   :  { %677 = vst [vmem:[%s1738_s5 + $0x20] sm:$0xff] %v670_v18 }
 0x1ff   :  { %678 = vst [vmem:[%s1738_s5 + $0x28] sm:$0xff] %v671_v19 }

</bundles_post_ra>
